<compile_context>
chip_gen: v7x
topology: tpu7x:2x2x1
jax: 0.10.0
libtpu: 0.0.40
codegen_flags: <defaults>
</compile_context>

<pallas_src>
import functools

import jax
import jax.numpy as jnp
from jax.experimental import pallas as pl
from jax.experimental.pallas import tpu as pltpu


def _rup8(n):
    return ((n + 7) // 8) * 8


# ----------------------------------------------------------------------------
# kernel
# ----------------------------------------------------------------------------
def _mdc_kernel(*refs, bt, T, c_in, c_out, ks, dils, pads, max_pad, stride,
                halo_x, row_x, halo_y, row_y, pad_post, T_out,
                fuse_final, halo_z, row_z, neg_slope):
    """One MDC layer (all dilated branches fused, stride in-kernel), optionally
    fused with SBDBlock.post_conv as an epilogue (last layer only)."""
    f32 = jnp.float32
    bf16 = jnp.bfloat16
    num_d = len(ks)

    if fuse_final:
        (x_ref, w_bd_ref, w_post_ref, w_fin_ref,
         out_ref, fin_ref, xpad, ypad, zpad) = refs
    else:
        x_ref, w_bd_ref, w_post_ref, out_ref, xpad, ypad = refs
        w_fin_ref = fin_ref = zpad = None

    # ---- stage input into halo-padded scratch (per-sample, aligned blocks) --
    # Only the halo rows that are actually read are zeroed; interiors are
    # fully overwritten every grid step.
    for s in range(bt):
        base = s * row_x + halo_x
        if max_pad > 0:
            xpad[pl.ds(base - max_pad, max_pad), :] = jnp.zeros((max_pad, c_in), f32)
            xpad[pl.ds(base + T, max_pad), :] = jnp.zeros((max_pad, c_in), f32)
        xpad[pl.ds(base, T), :] = x_ref[s].astype(f32)

    # ---- ALL dilated branches in one fused MXU call --------------------------
    # staged: (bt*T, sum_k*C_in + 1), last lane = 1 (bias folding);
    # w_bd: block-diagonal (sum_k*C_in + 1, num_d*C_out) with bias row.
    cols = []
    for j in range(num_d):
        k, d, pad = ks[j], dils[j], pads[j]
        for t in range(k):
            off = halo_x - pad + t * d                      # static
            parts = [xpad[pl.ds(s * row_x + off, T), :] for s in range(bt)]
            cols.append(parts[0] if bt == 1 else jnp.concatenate(parts, axis=0))
    ones = jnp.ones((bt * T, 1), f32)
    staged = jnp.concatenate(cols + [ones], axis=-1).astype(bf16)
    acts = jnp.dot(staged, w_bd_ref[...], preferred_element_type=f32)
    acts = jnp.where(acts >= 0, acts, neg_slope * acts)     # leaky_relu, f32 VPU
    y = acts[:, :c_out]
    for j in range(1, num_d):                               # sum over branches
        y = y + acts[:, j * c_out:(j + 1) * c_out]

    # ---- stage branch sum for the post conv ---------------------------------
    for s in range(bt):
        base = s * row_y + halo_y
        if pad_post > 0:
            ypad[pl.ds(base - pad_post, pad_post), :] = jnp.zeros((pad_post, c_out), f32)
            ypad[pl.ds(base + T, pad_post), :] = jnp.zeros((pad_post, c_out), f32)
        ypad[pl.ds(base, T), :] = y[s * T:(s + 1) * T, :]

    # ---- post conv (kernel 3, stride applied here via strided reads) --------
    cols_p = []
    for t in range(3):
        parts = []
        for s in range(bt):
            start = s * row_y + halo_y - pad_post + t       # static
            if stride == 1:
                parts.append(ypad[pl.ds(start, T_out), :])
            else:
                parts.append(ypad[pl.ds(start, T_out, stride=stride), :])
        cols_p.append(parts[0] if bt == 1 else jnp.concatenate(parts, axis=0))
    ones_p = jnp.ones((bt * T_out, 1), f32)
    staged_p = jnp.concatenate(cols_p + [ones_p], axis=-1).astype(bf16)
    post = jnp.dot(staged_p, w_post_ref[...], preferred_element_type=f32)
    h = jnp.where(post >= 0, post, neg_slope * post)        # (bt*T_out, c_out)

    for s in range(bt):
        out_ref[s] = h[s * T_out:(s + 1) * T_out, :].astype(out_ref.dtype)

    # ---- fused SBDBlock.post_conv epilogue (last layer only) ----------------
    if fuse_final:
        for s in range(bt):
            base = s * row_z + halo_z
            zpad[pl.ds(base - 1, 1), :] = jnp.zeros((1, c_out), f32)
            zpad[pl.ds(base + T_out, 1), :] = jnp.zeros((1, c_out), f32)
            zpad[pl.ds(base, T_out), :] = h[s * T_out:(s + 1) * T_out, :]
        cols_f = []
        for t in range(3):
            parts = [zpad[pl.ds(s * row_z + halo_z - 1 + t, T_out), :]
                     for s in range(bt)]
            cols_f.append(parts[0] if bt == 1 else jnp.concatenate(parts, axis=0))
        ones_f = jnp.ones((bt * T_out, 1), f32)
        staged_f = jnp.concatenate(cols_f + [ones_f], axis=-1).astype(bf16)
        fin = jnp.dot(staged_f, w_fin_ref[...], preferred_element_type=f32)
        for s in range(bt):
            fin_ref[s] = fin[s * T_out:(s + 1) * T_out, :]


# ----------------------------------------------------------------------------
# wrapper
# ----------------------------------------------------------------------------
_VMEM_LIMIT = 32 * 1024 * 1024   # safe on v5e/v6e/v7x (do not budget full 64 MiB on v7x)


def _full_spec(a):
    nd = a.ndim
    return pl.BlockSpec(a.shape, lambda g, _nd=nd: (0,) * _nd)


def _mdc_layer(x, layer_p, *, ks, dils, stride, w_fin=None, neg_slope=0.2):
    """x: (B, T, C_in) bf16 NLC.  Returns h: (B, T_out, C_out) bf16
    (and fin: (B, T_out, 1) f32 if w_fin is given — last layer)."""
    B, T, C_in = x.shape
    w_bd, w_post = layer_p["w_bd"], layer_p["w_post"]
    C_out = w_post.shape[-1]
    num_d = len(ks)

    pads = tuple(((k - 1) * d) // 2 for k, d in zip(ks, dils))
    for k, d in zip(ks, dils):
        assert ((k - 1) * d) % 2 == 0, "dilated convs must preserve length"
    max_pad = max(pads)
    pad_post = ((ks[-1] - 1) * dils[-1]) // 2           # module uses LAST (_k,_d)
    T_out = (T + 2 * pad_post - 3) // stride + 1

    # batch tiling: two grid steps when possible (v7x: both TensorCores busy)
    nb = 2 if (B % 2 == 0 and B >= 2) else 1
    bt = B // nb

    halo_x = _rup8(max_pad)
    row_x = _rup8(T + 2 * halo_x)
    halo_y = _rup8(pad_post)
    row_y = _rup8(T + 2 * halo_y)
    fuse_final = w_fin is not None
    halo_z = 8 if fuse_final else 0
    row_z = _rup8(T_out + 2 * halo_z) if fuse_final else 0

    kernel = functools.partial(
        _mdc_kernel, bt=bt, T=T, c_in=C_in, c_out=C_out, ks=tuple(ks),
        dils=tuple(dils), pads=pads, max_pad=max_pad, stride=stride,
        halo_x=halo_x, row_x=row_x, halo_y=halo_y, row_y=row_y,
        pad_post=pad_post, T_out=T_out, fuse_final=fuse_final,
        halo_z=halo_z, row_z=row_z, neg_slope=neg_slope)

    inputs = [x, w_bd, w_post]
    in_specs = [pl.BlockSpec((bt, T, C_in), lambda g: (g, 0, 0)),
                _full_spec(w_bd), _full_spec(w_post)]
    out_shapes = [jax.ShapeDtypeStruct((B, T_out, C_out), jnp.bfloat16)]
    out_specs = [pl.BlockSpec((bt, T_out, C_out), lambda g: (g, 0, 0))]
    scratch = [pltpu.VMEM((bt * row_x, C_in), jnp.float32),
               pltpu.VMEM((bt * row_y, C_out), jnp.float32)]
    if fuse_final:
        inputs.append(w_fin)
        in_specs.append(_full_spec(w_fin))
        out_shapes.append(jax.ShapeDtypeStruct((B, T_out, 1), jnp.float32))
        out_specs.append(pl.BlockSpec((bt, T_out, 1), lambda g: (g, 0, 0)))
        scratch.append(pltpu.VMEM((bt * row_z, C_out), jnp.float32))

    flops = int(2 * B * T * sum(k * C_in for k in ks) * C_out
                + 2 * B * T_out * 3 * C_out * C_out
                + (2 * B * T_out * 3 * C_out if fuse_final else 0))
    bytes_accessed = int(x.size * x.dtype.itemsize
                         + B * T_out * C_out * 2
                         + sum(w.size * w.dtype.itemsize for w in inputs[1:])
                         + (B * T_out * 4 if fuse_final else 0))

    res = pl.pallas_call(
        kernel,
        out_shape=tuple(out_shapes),
        grid_spec=pltpu.PrefetchScalarGridSpec(
            num_scalar_prefetch=0,
            grid=(nb,),
            in_specs=in_specs,
            out_specs=out_specs,
            scratch_shapes=scratch),
        compiler_params=pltpu.CompilerParams(
            dimension_semantics=("parallel",),
            vmem_limit_bytes=_VMEM_LIMIT),
        cost_estimate=pl.CostEstimate(flops=flops, transcendentals=0,
                                      bytes_accessed=bytes_accessed),
    )(*inputs)

    if fuse_final:
        h, fin = res
        return h, fin
    (h,) = res
    return h


def sbd_block(x, params, *, strides, kernel_size, dilations):
    """x: (B, segment_dim, T) PyTorch NCL layout.
    Returns (x_r, x_g, fmap_r, fmap_g) matching SBDBlock.forward."""
    B = x.shape[0]
    h = jnp.transpose(x, (0, 2, 1)).astype(jnp.bfloat16)   # NLC, bf16 carrier
    fmap_r, fmap_g = [], []
    n_layers = len(params["layers"])
    fin = None
    for i, layer_p in enumerate(params["layers"]):
        is_last = (i == n_layers - 1)
        out = _mdc_layer(h, layer_p, ks=kernel_size[i], dils=dilations[i],
                         stride=strides[i],
                         w_fin=params["w_final"] if is_last else None)
        if is_last:
            h, fin = out
        else:
            h = out
        f = jnp.transpose(h, (0, 2, 1)).astype(jnp.float32)   # fmap NCL, f32
        fmap_r.append(f[: B // 2])
        fmap_g.append(f[B // 2:])
    out = jnp.transpose(fin, (0, 2, 1))                       # (B, 1, T_last)
    return out[: B // 2], out[B // 2:], fmap_r, fmap_g


# ----------------------------------------------------------------------------
# synthetic parameters: weight_norm folded; dilated branches pre-fused into a
# block-diagonal weight with a bias row; post/final convs get a bias row too.
# ----------------------------------------------------------------------------
def init_params(key, segment_dim, filters, kernel_size, dilations):
    layers = []
    c_in = segment_dim
    keys = jax.random.split(key, len(filters) + 1)
    s = 0.1
    for i, c_out in enumerate(filters):
        ks = kernel_size[i]
        num_d = len(ks)
        lk = jax.random.split(keys[i], 2 * num_d + 2)
        sum_k = sum(ks)
        w_bd = jnp.zeros((sum_k * c_in + 1, num_d * c_out), jnp.float32)
        row_off = 0
        for j, k in enumerate(ks):
            w = jax.random.normal(lk[2 * j], (k * c_in, c_out), jnp.float32) * s
            b = jax.random.normal(lk[2 * j + 1], (c_out,), jnp.float32) * s
            w_bd = w_bd.at[row_off:row_off + k * c_in,
                           j * c_out:(j + 1) * c_out].set(w)
            w_bd = w_bd.at[-1, j * c_out:(j + 1) * c_out].set(b)
            row_off += k * c_in
        w_post = jax.random.normal(lk[-2], (3 * c_out, c_out), jnp.float32) * s
        b_post = jax.random.normal(lk[-1], (c_out,), jnp.float32) * s
        w_post = jnp.concatenate([w_post, b_post[None, :]], axis=0)
        layers.append(dict(w_bd=w_bd.astype(jnp.bfloat16),
                           w_post=w_post.astype(jnp.bfloat16)))
        c_in = c_out
    fk = jax.random.split(keys[-1], 2)
    w_final = jax.random.normal(fk[0], (3 * c_in, 1), jnp.float32) * s
    b_final = jax.random.normal(fk[1], (1,), jnp.float32) * s
    w_final = jnp.concatenate([w_final, b_final[None, :]], axis=0)
    return dict(layers=layers, w_final=w_final.astype(jnp.bfloat16))


# ----------------------------------------------------------------------------
if __name__ == "__main__":
    # small, module-consistent shapes
    B, segment_dim, T = 4, 8, 16
    filters = [16, 32]
    strides = [1, 2]
    kernel_size = [[3, 5], [3, 3]]
    dilations = [[1, 2], [1, 2]]

    key = jax.random.PRNGKey(0)
    kx, kp = jax.random.split(key)
    x = jax.random.normal(kx, (B, segment_dim, T), jnp.float32)   # PyTorch NCL
    params = init_params(kp, segment_dim, filters, kernel_size, dilations)

    x_r, x_g, fmap_r, fmap_g = sbd_block(
        x, params, strides=strides, kernel_size=kernel_size, dilations=dilations)
    jax.block_until_ready((x_r, x_g, fmap_r, fmap_g))

    # reference output lengths (post_conv padding uses the LAST (_k, _d) of each MDC)
    def post_len(t, k_last, d_last, s):
        p = ((k_last - 1) * d_last) // 2
        return (t + 2 * p - 3) // s + 1

    T1 = post_len(T, kernel_size[0][-1], dilations[0][-1], strides[0])   # 22
    T2 = post_len(T1, kernel_size[1][-1], dilations[1][-1], strides[1])  # 12

    assert x_r.shape == (B // 2, 1, T2) and x_g.shape == (B // 2, 1, T2)
    assert fmap_r[0].shape == (B // 2, filters[0], T1)
    assert fmap_g[0].shape == (B // 2, filters[0], T1)
    assert fmap_r[1].shape == (B // 2, filters[1], T2)
    assert fmap_g[1].shape == (B // 2, filters[1], T2)
    assert bool(jnp.all(jnp.isfinite(x_r))) and bool(jnp.all(jnp.isfinite(x_g)))
    print("KERNEL_OK")
</pallas_src>

<mosaic_0001>
module attributes {stable_mosaic.version = 11 : i64} {
  func.func @_mdc_kernel(%arg0: i32, %arg1: memref<2x16x8xbf16, #tpu.memory_space<vmem>>, %arg2: memref<65x32xbf16, #tpu.memory_space<vmem>>, %arg3: memref<49x16xbf16, #tpu.memory_space<vmem>>, %arg4: memref<2x22x16xbf16, #tpu.memory_space<vmem>>, %arg5: memref<64x8xf32, #tpu.memory_space<vmem>>, %arg6: memref<64x16xf32, #tpu.memory_space<vmem>>) attributes {dimension_semantics = [#tpu.dimension_semantics<parallel>], iteration_bounds = array<i64: 2>, scalar_prefetch = 0 : i64, scratch_operands = 2 : i64, tpu.core_type = #tpu.core_type<tc>, window_params = [{transform_indices = @transform_0, window_bounds = array<i64: 2, 16, 8>}, {pipeline_mode = #tpu.pipeline_mode<synchronous>, transform_indices = @transform_1, window_bounds = array<i64: 65, 32>}, {pipeline_mode = #tpu.pipeline_mode<synchronous>, transform_indices = @transform_2, window_bounds = array<i64: 49, 16>}, {transform_indices = @transform_3, window_bounds = array<i64: 2, 22, 16>}]} {
    %cst = arith.constant 0.000000e+00 : f32
    %0 = vector.broadcast %cst : f32 to vector<4x8xf32>
    %c4 = arith.constant 4 : index
    %c0 = arith.constant 0 : index
    %1 = vector.load %arg5[%c4, %c0] : memref<64x8xf32, #tpu.memory_space<vmem>>, vector<4x8xf32>
    tpu.vector_store %arg5[%c4, %c0], %0 {strides = array<i32>} : memref<64x8xf32, #tpu.memory_space<vmem>>, vector<4x8xf32>,
    %cst_0 = arith.constant 0.000000e+00 : f32
    %2 = vector.broadcast %cst_0 : f32 to vector<4x8xf32>
    %c24 = arith.constant 24 : index
    %c0_1 = arith.constant 0 : index
    %3 = vector.load %arg5[%c24, %c0_1] : memref<64x8xf32, #tpu.memory_space<vmem>>, vector<4x8xf32>
    tpu.vector_store %arg5[%c24, %c0_1], %2 {strides = array<i32>} : memref<64x8xf32, #tpu.memory_space<vmem>>, vector<4x8xf32>,
    %c0_2 = arith.constant 0 : index
    %c0_3 = arith.constant 0 : index
    %c0_4 = arith.constant 0 : index
    %4 = vector.load %arg1[%c0_2, %c0_3, %c0_4] : memref<2x16x8xbf16, #tpu.memory_space<vmem>>, vector<1x16x8xbf16>
    %5 = vector.shape_cast %4 : vector<1x16x8xbf16> to vector<16x8xbf16>
    %6 = arith.extf %5 : vector<16x8xbf16> to vector<16x8xf32>
    %c8 = arith.constant 8 : index
    %c0_5 = arith.constant 0 : index
    %7 = vector.load %arg5[%c8, %c0_5] : memref<64x8xf32, #tpu.memory_space<vmem>>, vector<16x8xf32>
    tpu.vector_store %arg5[%c8, %c0_5], %6 {strides = array<i32>} : memref<64x8xf32, #tpu.memory_space<vmem>>, vector<16x8xf32>,
    %cst_6 = arith.constant 0.000000e+00 : f32
    %8 = vector.broadcast %cst_6 : f32 to vector<4x8xf32>
    %c36 = arith.constant 36 : index
    %c0_7 = arith.constant 0 : index
    %9 = vector.load %arg5[%c36, %c0_7] : memref<64x8xf32, #tpu.memory_space<vmem>>, vector<4x8xf32>
    tpu.vector_store %arg5[%c36, %c0_7], %8 {strides = array<i32>} : memref<64x8xf32, #tpu.memory_space<vmem>>, vector<4x8xf32>,
    %cst_8 = arith.constant 0.000000e+00 : f32
    %10 = vector.broadcast %cst_8 : f32 to vector<4x8xf32>
    %c56 = arith.constant 56 : index
    %c0_9 = arith.constant 0 : index
    %11 = vector.load %arg5[%c56, %c0_9] : memref<64x8xf32, #tpu.memory_space<vmem>>, vector<4x8xf32>
    tpu.vector_store %arg5[%c56, %c0_9], %10 {strides = array<i32>} : memref<64x8xf32, #tpu.memory_space<vmem>>, vector<4x8xf32>,
    %c1 = arith.constant 1 : index
    %c0_10 = arith.constant 0 : index
    %c0_11 = arith.constant 0 : index
    %12 = vector.load %arg1[%c1, %c0_10, %c0_11] : memref<2x16x8xbf16, #tpu.memory_space<vmem>>, vector<1x16x8xbf16>
    %13 = vector.shape_cast %12 : vector<1x16x8xbf16> to vector<16x8xbf16>
    %14 = arith.extf %13 : vector<16x8xbf16> to vector<16x8xf32>
    %c40 = arith.constant 40 : index
    %c0_12 = arith.constant 0 : index
    %15 = vector.load %arg5[%c40, %c0_12] : memref<64x8xf32, #tpu.memory_space<vmem>>, vector<16x8xf32>
    tpu.vector_store %arg5[%c40, %c0_12], %14 {strides = array<i32>} : memref<64x8xf32, #tpu.memory_space<vmem>>, vector<16x8xf32>,
    %c7 = arith.constant 7 : index
    %c0_13 = arith.constant 0 : index
    %16 = vector.load %arg5[%c7, %c0_13] : memref<64x8xf32, #tpu.memory_space<vmem>>, vector<16x8xf32>
    %c39 = arith.constant 39 : index
    %c0_14 = arith.constant 0 : index
    %17 = vector.load %arg5[%c39, %c0_14] : memref<64x8xf32, #tpu.memory_space<vmem>>, vector<16x8xf32>
    %18 = tpu.concatenate %16, %17 in 0 : vector<16x8xf32>, vector<16x8xf32> -> vector<32x8xf32>
    %c8_15 = arith.constant 8 : index
    %c0_16 = arith.constant 0 : index
    %19 = vector.load %arg5[%c8_15, %c0_16] : memref<64x8xf32, #tpu.memory_space<vmem>>, vector<16x8xf32>
    %c40_17 = arith.constant 40 : index
    %c0_18 = arith.constant 0 : index
    %20 = vector.load %arg5[%c40_17, %c0_18] : memref<64x8xf32, #tpu.memory_space<vmem>>, vector<16x8xf32>
    %21 = tpu.concatenate %19, %20 in 0 : vector<16x8xf32>, vector<16x8xf32> -> vector<32x8xf32>
    %c9 = arith.constant 9 : index
    %c0_19 = arith.constant 0 : index
    %22 = vector.load %arg5[%c9, %c0_19] : memref<64x8xf32, #tpu.memory_space<vmem>>, vector<16x8xf32>
    %c41 = arith.constant 41 : index
    %c0_20 = arith.constant 0 : index
    %23 = vector.load %arg5[%c41, %c0_20] : memref<64x8xf32, #tpu.memory_space<vmem>>, vector<16x8xf32>
    %24 = tpu.concatenate %22, %23 in 0 : vector<16x8xf32>, vector<16x8xf32> -> vector<32x8xf32>
    %c4_21 = arith.constant 4 : index
    %c0_22 = arith.constant 0 : index
    %25 = vector.load %arg5[%c4_21, %c0_22] : memref<64x8xf32, #tpu.memory_space<vmem>>, vector<16x8xf32>
    %c36_23 = arith.constant 36 : index
    %c0_24 = arith.constant 0 : index
    %26 = vector.load %arg5[%c36_23, %c0_24] : memref<64x8xf32, #tpu.memory_space<vmem>>, vector<16x8xf32>
    %27 = tpu.concatenate %25, %26 in 0 : vector<16x8xf32>, vector<16x8xf32> -> vector<32x8xf32>
    %c6 = arith.constant 6 : index
    %c0_25 = arith.constant 0 : index
    %28 = vector.load %arg5[%c6, %c0_25] : memref<64x8xf32, #tpu.memory_space<vmem>>, vector<16x8xf32>
    %c38 = arith.constant 38 : index
    %c0_26 = arith.constant 0 : index
    %29 = vector.load %arg5[%c38, %c0_26] : memref<64x8xf32, #tpu.memory_space<vmem>>, vector<16x8xf32>
    %30 = tpu.concatenate %28, %29 in 0 : vector<16x8xf32>, vector<16x8xf32> -> vector<32x8xf32>
    %c8_27 = arith.constant 8 : index
    %c0_28 = arith.constant 0 : index
    %31 = vector.load %arg5[%c8_27, %c0_28] : memref<64x8xf32, #tpu.memory_space<vmem>>, vector<16x8xf32>
    %c40_29 = arith.constant 40 : index
    %c0_30 = arith.constant 0 : index
    %32 = vector.load %arg5[%c40_29, %c0_30] : memref<64x8xf32, #tpu.memory_space<vmem>>, vector<16x8xf32>
    %33 = tpu.concatenate %31, %32 in 0 : vector<16x8xf32>, vector<16x8xf32> -> vector<32x8xf32>
    %c10 = arith.constant 10 : index
    %c0_31 = arith.constant 0 : index
    %34 = vector.load %arg5[%c10, %c0_31] : memref<64x8xf32, #tpu.memory_space<vmem>>, vector<16x8xf32>
    %c42 = arith.constant 42 : index
    %c0_32 = arith.constant 0 : index
    %35 = vector.load %arg5[%c42, %c0_32] : memref<64x8xf32, #tpu.memory_space<vmem>>, vector<16x8xf32>
    %36 = tpu.concatenate %34, %35 in 0 : vector<16x8xf32>, vector<16x8xf32> -> vector<32x8xf32>
    %c12 = arith.constant 12 : index
    %c0_33 = arith.constant 0 : index
    %37 = vector.load %arg5[%c12, %c0_33] : memref<64x8xf32, #tpu.memory_space<vmem>>, vector<16x8xf32>
    %c44 = arith.constant 44 : index
    %c0_34 = arith.constant 0 : index
    %38 = vector.load %arg5[%c44, %c0_34] : memref<64x8xf32, #tpu.memory_space<vmem>>, vector<16x8xf32>
    %39 = tpu.concatenate %37, %38 in 0 : vector<16x8xf32>, vector<16x8xf32> -> vector<32x8xf32>
    %cst_35 = arith.constant 1.000000e+00 : f32
    %40 = vector.broadcast %cst_35 : f32 to vector<32x1xf32>
    %41 = tpu.concatenate %18, %21, %24, %27, %30, %33, %36, %39, %40 in 1 : vector<32x8xf32>, vector<32x8xf32>, vector<32x8xf32>, vector<32x8xf32>, vector<32x8xf32>, vector<32x8xf32>, vector<32x8xf32>, vector<32x8xf32>, vector<32x1xf32> -> vector<32x65xf32>
    %42 = arith.truncf %41 : vector<32x65xf32> to vector<32x65xbf16>
    %c0_36 = arith.constant 0 : index
    %c0_37 = arith.constant 0 : index
    %43 = vector.load %arg2[%c0_36, %c0_37] : memref<65x32xbf16, #tpu.memory_space<vmem>>, vector<65x32xbf16>
    %cst_38 = arith.constant dense<0.000000e+00> : vector<32x32xf32>
    %44 = tpu.matmul %42, %43, %cst_38 {dimension_numbers = #tpu.dot_dimension_numbers<[1], [0], [0], [1], [0, 0, 1, 1], [], []>} : vector<32x65xbf16>, vector<65x32xbf16>, vector<32x32xf32> -> vector<32x32xf32>
    %cst_39 = arith.constant 0.000000e+00 : f32
    %45 = vector.broadcast %cst_39 : f32 to vector<32x32xf32>
    %46 = arith.cmpf oge, %44, %45 : vector<32x32xf32>
    %cst_40 = arith.constant 2.000000e-01 : f32
    %47 = vector.broadcast %cst_40 : f32 to vector<32x32xf32>
    %48 = arith.mulf %47, %44 : vector<32x32xf32>
    %49 = arith.select %46, %44, %48 : vector<32x32xi1>, vector<32x32xf32>
    %50 = vector.extract_strided_slice %49 {offsets = [0, 0], sizes = [32, 16], strides = [1, 1]} : vector<32x32xf32> to vector<32x16xf32>
    %51 = vector.extract_strided_slice %49 {offsets = [0, 16], sizes = [32, 16], strides = [1, 1]} : vector<32x32xf32> to vector<32x16xf32>
    %52 = arith.addf %50, %51 : vector<32x16xf32>
    %cst_41 = arith.constant 0.000000e+00 : f32
    %53 = vector.broadcast %cst_41 : f32 to vector<4x16xf32>
    %c4_42 = arith.constant 4 : index
    %c0_43 = arith.constant 0 : index
    %54 = vector.load %arg6[%c4_42, %c0_43] : memref<64x16xf32, #tpu.memory_space<vmem>>, vector<4x16xf32>
    tpu.vector_store %arg6[%c4_42, %c0_43], %53 {strides = array<i32>} : memref<64x16xf32, #tpu.memory_space<vmem>>, vector<4x16xf32>,
    %cst_44 = arith.constant 0.000000e+00 : f32
    %55 = vector.broadcast %cst_44 : f32 to vector<4x16xf32>
    %c24_45 = arith.constant 24 : index
    %c0_46 = arith.constant 0 : index
    %56 = vector.load %arg6[%c24_45, %c0_46] : memref<64x16xf32, #tpu.memory_space<vmem>>, vector<4x16xf32>
    tpu.vector_store %arg6[%c24_45, %c0_46], %55 {strides = array<i32>} : memref<64x16xf32, #tpu.memory_space<vmem>>, vector<4x16xf32>,
    %57 = vector.extract_strided_slice %52 {offsets = [0, 0], sizes = [16, 16], strides = [1, 1]} : vector<32x16xf32> to vector<16x16xf32>
    %c8_47 = arith.constant 8 : index
    %c0_48 = arith.constant 0 : index
    %58 = vector.load %arg6[%c8_47, %c0_48] : memref<64x16xf32, #tpu.memory_space<vmem>>, vector<16x16xf32>
    tpu.vector_store %arg6[%c8_47, %c0_48], %57 {strides = array<i32>} : memref<64x16xf32, #tpu.memory_space<vmem>>, vector<16x16xf32>,
    %cst_49 = arith.constant 0.000000e+00 : f32
    %59 = vector.broadcast %cst_49 : f32 to vector<4x16xf32>
    %c36_50 = arith.constant 36 : index
    %c0_51 = arith.constant 0 : index
    %60 = vector.load %arg6[%c36_50, %c0_51] : memref<64x16xf32, #tpu.memory_space<vmem>>, vector<4x16xf32>
    tpu.vector_store %arg6[%c36_50, %c0_51], %59 {strides = array<i32>} : memref<64x16xf32, #tpu.memory_space<vmem>>, vector<4x16xf32>,
    %cst_52 = arith.constant 0.000000e+00 : f32
    %61 = vector.broadcast %cst_52 : f32 to vector<4x16xf32>
    %c56_53 = arith.constant 56 : index
    %c0_54 = arith.constant 0 : index
    %62 = vector.load %arg6[%c56_53, %c0_54] : memref<64x16xf32, #tpu.memory_space<vmem>>, vector<4x16xf32>
    tpu.vector_store %arg6[%c56_53, %c0_54], %61 {strides = array<i32>} : memref<64x16xf32, #tpu.memory_space<vmem>>, vector<4x16xf32>,
    %63 = vector.extract_strided_slice %52 {offsets = [16, 0], sizes = [16, 16], strides = [1, 1]} : vector<32x16xf32> to vector<16x16xf32>
    %c40_55 = arith.constant 40 : index
    %c0_56 = arith.constant 0 : index
    %64 = vector.load %arg6[%c40_55, %c0_56] : memref<64x16xf32, #tpu.memory_space<vmem>>, vector<16x16xf32>
    tpu.vector_store %arg6[%c40_55, %c0_56], %63 {strides = array<i32>} : memref<64x16xf32, #tpu.memory_space<vmem>>, vector<16x16xf32>,
    %c4_57 = arith.constant 4 : index
    %c0_58 = arith.constant 0 : index
    %65 = vector.load %arg6[%c4_57, %c0_58] : memref<64x16xf32, #tpu.memory_space<vmem>>, vector<22x16xf32>
    %c36_59 = arith.constant 36 : index
    %c0_60 = arith.constant 0 : index
    %66 = vector.load %arg6[%c36_59, %c0_60] : memref<64x16xf32, #tpu.memory_space<vmem>>, vector<22x16xf32>
    %67 = tpu.concatenate %65, %66 in 0 : vector<22x16xf32>, vector<22x16xf32> -> vector<44x16xf32>
    %c5 = arith.constant 5 : index
    %c0_61 = arith.constant 0 : index
    %68 = vector.load %arg6[%c5, %c0_61] : memref<64x16xf32, #tpu.memory_space<vmem>>, vector<22x16xf32>
    %c37 = arith.constant 37 : index
    %c0_62 = arith.constant 0 : index
    %69 = vector.load %arg6[%c37, %c0_62] : memref<64x16xf32, #tpu.memory_space<vmem>>, vector<22x16xf32>
    %70 = tpu.concatenate %68, %69 in 0 : vector<22x16xf32>, vector<22x16xf32> -> vector<44x16xf32>
    %c6_63 = arith.constant 6 : index
    %c0_64 = arith.constant 0 : index
    %71 = vector.load %arg6[%c6_63, %c0_64] : memref<64x16xf32, #tpu.memory_space<vmem>>, vector<22x16xf32>
    %c38_65 = arith.constant 38 : index
    %c0_66 = arith.constant 0 : index
    %72 = vector.load %arg6[%c38_65, %c0_66] : memref<64x16xf32, #tpu.memory_space<vmem>>, vector<22x16xf32>
    %73 = tpu.concatenate %71, %72 in 0 : vector<22x16xf32>, vector<22x16xf32> -> vector<44x16xf32>
    %cst_67 = arith.constant 1.000000e+00 : f32
    %74 = vector.broadcast %cst_67 : f32 to vector<44x1xf32>
    %75 = tpu.concatenate %67, %70, %73, %74 in 1 : vector<44x16xf32>, vector<44x16xf32>, vector<44x16xf32>, vector<44x1xf32> -> vector<44x49xf32>
    %76 = arith.truncf %75 : vector<44x49xf32> to vector<44x49xbf16>
    %c0_68 = arith.constant 0 : index
    %c0_69 = arith.constant 0 : index
    %77 = vector.load %arg3[%c0_68, %c0_69] : memref<49x16xbf16, #tpu.memory_space<vmem>>, vector<49x16xbf16>
    %cst_70 = arith.constant dense<0.000000e+00> : vector<44x16xf32>
    %78 = tpu.matmul %76, %77, %cst_70 {dimension_numbers = #tpu.dot_dimension_numbers<[1], [0], [0], [1], [0, 0, 1, 1], [], []>} : vector<44x49xbf16>, vector<49x16xbf16>, vector<44x16xf32> -> vector<44x16xf32>
    %cst_71 = arith.constant 0.000000e+00 : f32
    %79 = vector.broadcast %cst_71 : f32 to vector<44x16xf32>
    %80 = arith.cmpf oge, %78, %79 : vector<44x16xf32>
    %cst_72 = arith.constant 2.000000e-01 : f32
    %81 = vector.broadcast %cst_72 : f32 to vector<44x16xf32>
    %82 = arith.mulf %81, %78 : vector<44x16xf32>
    %83 = arith.select %80, %78, %82 : vector<44x16xi1>, vector<44x16xf32>
    %84 = vector.extract_strided_slice %83 {offsets = [0, 0], sizes = [22, 16], strides = [1, 1]} : vector<44x16xf32> to vector<22x16xf32>
    %85 = arith.truncf %84 : vector<22x16xf32> to vector<22x16xbf16>
    %c0_73 = arith.constant 0 : index
    %c0_74 = arith.constant 0 : index
    %c0_75 = arith.constant 0 : index
    %86 = vector.load %arg4[%c0_73, %c0_74, %c0_75] : memref<2x22x16xbf16, #tpu.memory_space<vmem>>, vector<1x22x16xbf16>
    %87 = vector.shape_cast %86 : vector<1x22x16xbf16> to vector<22x16xbf16>
    %88 = vector.shape_cast %85 : vector<22x16xbf16> to vector<1x22x16xbf16>
    tpu.vector_store %arg4[%c0_73, %c0_74, %c0_75], %88 {strides = array<i32>} : memref<2x22x16xbf16, #tpu.memory_space<vmem>>, vector<1x22x16xbf16>,
    %89 = vector.extract_strided_slice %83 {offsets = [22, 0], sizes = [22, 16], strides = [1, 1]} : vector<44x16xf32> to vector<22x16xf32>
    %90 = arith.truncf %89 : vector<22x16xf32> to vector<22x16xbf16>
    %c1_76 = arith.constant 1 : index
    %c0_77 = arith.constant 0 : index
    %c0_78 = arith.constant 0 : index
    %91 = vector.load %arg4[%c1_76, %c0_77, %c0_78] : memref<2x22x16xbf16, #tpu.memory_space<vmem>>, vector<1x22x16xbf16>
    %92 = vector.shape_cast %91 : vector<1x22x16xbf16> to vector<22x16xbf16>
    %93 = vector.shape_cast %90 : vector<22x16xbf16> to vector<1x22x16xbf16>
    tpu.vector_store %arg4[%c1_76, %c0_77, %c0_78], %93 {strides = array<i32>} : memref<2x22x16xbf16, #tpu.memory_space<vmem>>, vector<1x22x16xbf16>,
    return
  }
  func.func @transform_0(%arg0: i32) -> (i32, i32, i32) {
    %c0_i32 = arith.constant 0 : i32
    %c0_i32_0 = arith.constant 0 : i32
    %c0_i32_1 = arith.constant 0 : i32
    return %arg0, %c0_i32, %c0_i32_0 : i32, i32, i32
  }
  func.func @transform_1(%arg0: i32) -> (i32, i32) {
    %c0_i32 = arith.constant 0 : i32
    %c0_i32_0 = arith.constant 0 : i32
    %c0_i32_1 = arith.constant 0 : i32
    return %c0_i32, %c0_i32_0 : i32, i32
  }
  func.func @transform_2(%arg0: i32) -> (i32, i32) {
    %c0_i32 = arith.constant 0 : i32
    %c0_i32_0 = arith.constant 0 : i32
    %c0_i32_1 = arith.constant 0 : i32
    return %c0_i32, %c0_i32_0 : i32, i32
  }
  func.func @transform_3(%arg0: i32) -> (i32, i32, i32) {
    %c0_i32 = arith.constant 0 : i32
    %c0_i32_0 = arith.constant 0 : i32
    %c0_i32_1 = arith.constant 0 : i32
    return %arg0, %c0_i32, %c0_i32_0 : i32, i32, i32
  }
}

</mosaic_0001>

<bundles_post_ra>
// kernel: tpu_custom_call.1
= control target key start
LH: loop header
LB: loop body
LE: loop exit
PB: predicated region body
PF: predicated region fallthrough
CT: control target
= control target key end

     0   :  { %s1121_s12 = smov 0   ;;  %s1301_s0 = inlined_call_operand.vmem [shape: bf16[4,16,8], index: 0, kind: input, shape index: {}]   ;;  %s1302_s1 = inlined_call_operand.vmem [shape: bf16[65,32], index: 1, kind: input, shape index: {}]   ;;  %s1303_s2 = inlined_call_operand.vmem [shape: bf16[49,16], index: 2, kind: input, shape index: {}]   ;;  %s1304_s3 = inlined_call_operand.vmem [shape: bf16[4,22,16], index: 3, kind: output, shape index: {}]  }
   0x1 LB: > { %s849_s13 = sadd.s32 4294967295, %s1088_s12   ;;  %p853_p0 = scmp.ge.s32.totalorder %s1088_s12, 1  ;;  %s1088_s12 = sphi %s1121_s12, %s13_s12  }
   0x2   : > { %p139_p1 = scmp.lt.s32.totalorder %s1088_s12, 3 }
   0x4   : > { %p140_p2 = pnand %p853_p0, %p139_p1 }
   0x5   : > { %s854_s14 = sshll.u32 (!%p140_p2), %s849_s13, 1  ;;  %vm180_vm0 = vcmask (!%p140_p2), 60416   ;;  %v1090_v0 = vmov (!%p140_p2), 0.0   ;;  %vm187_vm1 = vcmask (!%p140_p2), 64512   ;;  %s1091_s19 = smov (!%p140_p2), 16   ;;  %v1073_v27 = vld [vmem:[%s1302_s1] sm:$0xff] (!%p140_p2)  }
   0x6   : > { %143 = sbr.rel (%p140_p2) target bundleno = 883 (0x373), region = 32  ;;  %p166_p3 = scmp.lt.s32.totalorder (!%p140_p2), %s854_s14, 3  ;;  %182 = vst.msk [vmem:[#allocation2 + $0x18] sm:$0xf] (!%p140_p2), %vm180_vm0, %v1090_v0  ;;  %181 = vst.msk [vmem:[#allocation2 + $0x4] sm:$0xf] (!%p140_p2), %vm180_vm0, %v1090_v0  ;;  %933 = vmatprep.subr.bf16.mxu1 (!%p140_p2), %v1090_v0  ;;  %919 = vmatprep.subr.bf16.mxu0 (!%p140_p2), %v1073_v27 }
   0x7   : > { %190 = vst.msk [vmem:[#allocation2 + $0x24] sm:$0xf] (!%p140_p2), %vm180_vm0, %v1090_v0  ;;  %191 = vst.msk [vmem:[#allocation2 + $0x38] sm:$0xf] (!%p140_p2), %vm180_vm0, %v1090_v0  ;;  %s1092_s20 = smov (!%p140_p2), 8   ;;  %v1074_v30 = vld [vmem:[%s1302_s1 + $0x8] sm:$0xff] (!%p140_p2)   ;;  %920 = vmatpush3.bf16.msra.mxu0 (!%p140_p2), %v1073_v27 }
   0x8   : > { %s1093_s25 = smov (!%p140_p2), 24   ;;  %921 = vmatprep.subr.bf16.mxu0 (!%p140_p2), %v1074_v30  ;;  %v1075_v33 = vld [vmem:[%s1302_s1 + $0x10] sm:$0xff] (!%p140_p2)   ;;  %vm415_vm2 = vcmask (!%p140_p2), 1040384   ;;  %s1094_s28 = smov (!%p140_p2), 32   ;;  %v1076_v36 = vld [vmem:[%s1302_s1 + $0x18] sm:$0xff] (!%p140_p2)   ;;  %v1095_v40 = vmov (!%p140_p2), 0  }
   0x9   : > { %v1077_v37 = vld [vmem:[%s1302_s1 + $0x20] ss:$0 sps:$4 sm:$0x11] (!%p140_p2)   ;;  %v1164_v41 = vsel (!%p140_p2), %vm415_vm2, 65535, %v1095_v40  ;;  %s1096_s6 = smov (!%p140_p2), 40   ;;  %s1097_s7 = smov (!%p140_p2), 48  }
   0xa   : > { %v419_v45 = vand.u32 (!%p140_p2), %v1077_v37, %v1164_v41  ;;  %s1098_s8 = smov (!%p140_p2), 56   ;;  %vm335_vm3 = vcmask (!%p140_p2), 130048   ;;  %vm340_vm4 = vcmask (!%p140_p2), 195584   ;;  %vm345_vm5 = vcmask (!%p140_p2), 261120   ;;  %s1099_s9 = smov (!%p140_p2), 112  }
   0xb   : > { %922 = vmatpush3.bf16.msra.mxu0 (!%p140_p2), %v1074_v30  ;;  %vm350_vm6 = vcmask (!%p140_p2), 326656   ;;  %vm355_vm7 = vcmask (!%p140_p2), 392192   ;;  %vm360_vm8 = vcmask (!%p140_p2), 457728   ;;  %vm365_vm9 = vcmask (!%p140_p2), 523264  }
   0xc   : > { %923 = vmatprep.subr.bf16.mxu0 (!%p140_p2), %v1075_v33  ;;  %vm408_vm10 = vcmask (!%p140_p2), 531456   ;;  %vm502_vm11 = vcmask (!%p140_p2), 125952   ;;  %vm1100_vm0 = vmmov (!%p140_p2), 0  }
   0xd   : > { %s1308_s14 = smov (!%p166_p3, %s854_s14), 3  ;;  %503 = vst.msk [vmem:[#allocation3 + $0x4] sm:$0xf] %vm502_vm11, %v1090_v0  ;;  %504 = vst.msk [vmem:[#allocation3 + $0x18] sm:$0xf] %vm502_vm11, %v1090_v0  ;;  %941 = vmatprep.mubr.msk.bf16.mxu1 %vm1100_vm0, %v1090_v0 }
   0xe   : > { %s888_s15 = sshll.u32 %s1308_s14, 3  ;;  %507 = vst.msk [vmem:[#allocation3 + $0x24] sm:$0xf] %vm502_vm11, %v1090_v0  ;;  %508 = vst.msk [vmem:[#allocation3 + $0x38] sm:$0xf] %vm502_vm11, %v1090_v0 }
   0xf   : > { %s170_s18 = scalar_lea.vmem %s1301_s0, %s888_s15  ;;  %924 = vmatpush3.bf16.msra.mxu0 %v1075_v33 }
  0x10   : > { %v897_v1 = vld [vmem:[%s170_s18] sm:$0xff]   ;;  %v904_v2 = vld [vmem:[%s170_s18 + $0x8] sm:$0xff]   ;;  %925 = vmatprep.subr.bf16.mxu0 %v1076_v36 }
  0x11   : > { %v898_v3 = vunpack.c.l.bf16 %v897_v1  ;;  %v899_v4 = vunpack.c.h.bf16 %v897_v1  ;;  %v902_v5 = vunpack.c.l.bf16 %v904_v2  ;;  %v903_v6 = vunpack.c.h.bf16 %v904_v2 }
  0x13   : > { %188 = vst.msk [vmem:[#allocation2 + $0x8] sm:$0xff] %vm187_vm1, %v898_v3  ;;  %189 = vst.msk [vmem:[#allocation2 + $0x10] sm:$0xff] %vm187_vm1, %v899_v4  ;;  %926 = vmatpush3.bf16.msra.mxu0 %v1076_v36 }
  0x14   : > { %197 = vst.msk [vmem:[#allocation2 + $0x28] sm:$0xff] %vm187_vm1, %v902_v5  ;;  %198 = vst.msk [vmem:[#allocation2 + $0x30] sm:$0xff] %vm187_vm1, %v903_v6  ;;  %927 = vmatprep.subr.bf16.mxu0 %v419_v45 }
  0x17   : > { %928 = vmatpush3.bf16.msra.mxu0 %v419_v45 }
  0x1a   : > { %v207_v7 = vld [vmem:[#allocation2 + $0x9] sm:$0xff]  ;;  %v208_v8 = vld [vmem:[#allocation2 + $0x11] sm:$0xff] }
  0x1b   : > { %v203_v9 = vld [vmem:[#allocation2 + $0x8] sm:$0xff]  ;;  %v983_v10 = vpack.i.bf16 %v208_v8, %v207_v7  ;;  %v204_v11 = vld [vmem:[#allocation2 + $0x10] sm:$0xff] }
  0x1c   : > { %v209_v12 = vld [vmem:[#allocation2 + $0x29] sm:$0xff]  ;;  %v210_v13 = vld [vmem:[#allocation2 + $0x31] sm:$0xff]  ;;  %v973_v14 = vpack.i.bf16 %v204_v11, %v203_v9 }
  0x1d   : > { %v205_v15 = vld [vmem:[#allocation2 + $0x28] sm:$0xff]  ;;  %v206_v16 = vld [vmem:[#allocation2 + $0x30] sm:$0xff]  ;;  %984 = vrot.lane.b32.xlu1 %v983_v10, %s1091_s19  ;;  %v988_v17 = vpack.i.bf16 %v210_v13, %v209_v12 }
  0x1e   : > { %974 = vrot.lane.b32.xlu0 %v973_v14, %s1092_s20  ;;  %v978_v18 = vpack.i.bf16 %v206_v16, %v205_v15  ;;  %v213_v19 = vld [vmem:[#allocation2 + $0x24] sm:$0xff]  ;;  %v214_v20 = vld [vmem:[#allocation2 + $0x2c] sm:$0xff]  ;;  %v224_v44 = vld [vmem:[#allocation2 + $0x34] sm:$0xff] }
  0x1f   : > { %v211_v21 = vld [vmem:[#allocation2 + $0x4] sm:$0xff]  ;;  %v212_v22 = vld [vmem:[#allocation2 + $0xc] sm:$0xff]  ;;  %v998_v23 = vpack.i.bf16 %v214_v20, %v213_v19  ;;  %v223_v46 = vld [vmem:[#allocation2 + $0x14] sm:$0xff]  ;;  %v1038_v47 = vpack.i.bf16 %v224_v44, %v214_v20 }
  0x20   : > { %v993_v24 = vpack.i.bf16 %v212_v22, %v211_v21  ;;  %v217_v25 = vld [vmem:[#allocation2 + $0x26] sm:$0xff]  ;;  %v218_v26 = vld [vmem:[#allocation2 + $0x2e] sm:$0xff]  ;;  %v1033_v48 = vpack.i.bf16 %v223_v46, %v212_v22 }
  0x21   : > { %989 = vrot.lane.b32.xlu1 %v988_v17, %s1091_s19  ;;  %v215_v28 = vld [vmem:[#allocation2 + $0x6] sm:$0xff]  ;;  %v216_v29 = vld [vmem:[#allocation2 + $0xe] sm:$0xff]  ;;  %v1008_v31 = vpack.i.bf16 %v218_v26, %v217_v25 }
  0x22   : > { %979 = vrot.lane.b32.xlu0 %v978_v18, %s1092_s20  ;;  %v1003_v32 = vpack.i.bf16 %v216_v29, %v215_v28  ;;  %v221_v34 = vld [vmem:[#allocation2 + $0x2a] sm:$0xff]  ;;  %v222_v35 = vld [vmem:[#allocation2 + $0x32] sm:$0xff] }
  0x23   : > { %v219_v38 = vld [vmem:[#allocation2 + $0xa] sm:$0xff]  ;;  %v220_v39 = vld [vmem:[#allocation2 + $0x12] sm:$0xff]  ;;  %v1028_v42 = vpack.i.bf16 %v222_v35, %v221_v34 }
  0x24   : > { %v1023_v43 = vpack.i.bf16 %v220_v39, %v219_v38  ;;  %v199_v57 = vld [vmem:[#allocation2 + $0x7] sm:$0xff]  ;;  %v200_v58 = vld [vmem:[#allocation2 + $0xf] sm:$0xff] }
  0x25   : > { %999 = vrot.lane.b32.xlu1 %v998_v23, %s1093_s25  ;;  %v201_v62 = vld [vmem:[#allocation2 + $0x27] sm:$0xff]  ;;  %v202_v63 = vld [vmem:[#allocation2 + $0x2f] sm:$0xff] }
  0x26   : > { %994 = vrot.lane.b32.xlu0 %v993_v24, %s1093_s25 }
  0x29   : > { %1009 = vrot.lane.b32.xlu1 %v1008_v31, %s1094_s28 }
  0x2a   : > { %1004 = vrot.lane.b32.xlu0 %v1003_v32, %s1094_s28 }
  0x2d   : > { %1019 = vrot.lane.b32.xlu1 %v978_v18, %s1096_s6 }
  0x2e   : > { %1014 = vrot.lane.b32.xlu0 %v973_v14, %s1096_s6 }
  0x31   : > { %1029 = vrot.lane.b32.xlu1 %v1028_v42, %s1097_s7 }
  0x32   : > { %1024 = vrot.lane.b32.xlu0 %v1023_v43, %s1097_s7 }
  0x35   : > { %1039 = vrot.lane.b32.xlu1 %v1038_v47, %s1098_s8 }
  0x36   : > { %1034 = vrot.lane.b32.xlu0 %v1033_v48, %s1098_s8 }
  0x8f   : > { %v985_v49 = vpop.permute.xlu1 %984 }
  0x90   : > { %v975_v50 = vpop.permute.xlu0 %974  ;;  %v987_v2 = vunpack.i.h.bf16 %v985_v49  ;;  %v986_v3 = vunpack.i.l.bf16 %v985_v49 }
  0x91   : > { %v977_v55 = vunpack.i.h.bf16 %v975_v50  ;;  %v976_v56 = vunpack.i.l.bf16 %v975_v50 }
  0x93   : > { %v990_v51 = vpop.permute.xlu1 %989  ;;  %v331_v4 = vsel %vm187_vm1, %v199_v57, %v976_v56  ;;  %v332_v5 = vsel %vm187_vm1, %v200_v58, %v977_v55 }
  0x94   : > { %v980_v52 = vpop.permute.xlu0 %979  ;;  %v992_v6 = vunpack.i.h.bf16 %v990_v51  ;;  %v991_v7 = vunpack.i.l.bf16 %v990_v51  ;;  %v336_v16 = vsel %vm335_vm3, %v331_v4, %v986_v3  ;;  %v337_v17 = vsel %vm335_vm3, %v332_v5, %v987_v2 }
  0x95   : > { %v982_v59 = vunpack.i.h.bf16 %v980_v52  ;;  %v981_v60 = vunpack.i.l.bf16 %v980_v52 }
  0x97   : > { %v1000_v53 = vpop.permute.xlu1 %999  ;;  %v334_v8 = vsel %vm187_vm1, %v202_v63, %v982_v59  ;;  %v333_v9 = vsel %vm187_vm1, %v201_v62, %v981_v60  ;;  %vm520_vm1 = vcmask 1045504  }
  0x98   : > { %v995_v54 = vpop.permute.xlu0 %994  ;;  %v1002_v11 = vunpack.i.h.bf16 %v1000_v53  ;;  %v1001_v12 = vunpack.i.l.bf16 %v1000_v53  ;;  %v338_v18 = vsel %vm335_vm3, %v333_v9, %v991_v7  ;;  %v339_v19 = vsel %vm335_vm3, %v334_v8, %v992_v6 }
  0x99   : > { %v997_v14 = vunpack.i.h.bf16 %v995_v54  ;;  %v996_v15 = vunpack.i.l.bf16 %v995_v54 }
  0x9a   : > { %v343_v27 = vsel %vm340_vm4, %v338_v18, %v1001_v12  ;;  %v344_v28 = vsel %vm340_vm4, %v339_v19, %v1002_v11 }
  0x9b   : > { %v1010_v61 = vpop.permute.xlu1 %1009  ;;  %v341_v32 = vsel %vm340_vm4, %v336_v16, %v996_v15  ;;  %v342_v33 = vsel %vm340_vm4, %v337_v17, %v997_v14  ;;  %v1078_v16 = vld [vmem:[%s1303_s2] sm:$0xff]   ;;  %v1079_v17 = vld [vmem:[%s1303_s2 + $0x8] sm:$0xff]   ;;  %vm654_vm4 = vcmask 400384  }
  0x9c   : > { %v1005_v1 = vpop.permute.xlu0 %1004  ;;  %v1012_v20 = vunpack.i.h.bf16 %v1010_v61  ;;  %v1011_v21 = vunpack.i.l.bf16 %v1010_v61  ;;  %934 = vmatpush3.bf16.msra.mxu1 %v1078_v16 }
  0x9d   : > { %v1007_v22 = vunpack.i.h.bf16 %v1005_v1  ;;  %v1006_v23 = vunpack.i.l.bf16 %v1005_v1  ;;  %935 = vmatprep.subr.bf16.mxu1 %v1090_v0 }
  0x9e   : > { %v348_v36 = vsel %vm345_vm5, %v343_v27, %v1011_v21  ;;  %v349_v37 = vsel %vm345_vm5, %v344_v28, %v1012_v20  ;;  %v1080_v20 = vld [vmem:[%s1303_s2 + $0x10] sm:$0xff]  }
  0x9f   : > { %v1020_v10 = vpop.permute.xlu1 %1019  ;;  %v346_v40 = vsel %vm345_vm5, %v341_v32, %v1006_v23  ;;  %v347_v42 = vsel %vm345_vm5, %v342_v33, %v1007_v22  ;;  %v1081_v23 = vld [vmem:[%s1303_s2 + $0x18] ss:$0 sps:$4 sm:$0x11]  }
  0xa0   : > { %v1015_v13 = vpop.permute.xlu0 %1014  ;;  %v1022_v24 = vunpack.i.h.bf16 %v1020_v10  ;;  %v1021_v25 = vunpack.i.l.bf16 %v1020_v10  ;;  %936 = vmatpush3.bf16.msra.mxu1 %v1079_v17 }
  0xa1   : > { %v1017_v29 = vunpack.i.h.bf16 %v1015_v13  ;;  %v1016_v30 = vunpack.i.l.bf16 %v1015_v13  ;;  %937 = vmatprep.subr.bf16.mxu1 %v1090_v0 }
  0xa2   : > { %v353_v43 = vsel %vm350_vm6, %v348_v36, %v1021_v25  ;;  %v354_v44 = vsel %vm350_vm6, %v349_v37, %v1022_v24 }
  0xa3   : > { %v1030_v26 = vpop.permute.xlu1 %1029  ;;  %v351_v46 = vsel %vm350_vm6, %v346_v40, %v1016_v30  ;;  %v352_v47 = vsel %vm350_vm6, %v347_v42, %v1017_v29 }
  0xa4   : > { %v1025_v31 = vpop.permute.xlu0 %1024  ;;  %v1032_v34 = vunpack.i.h.bf16 %v1030_v26  ;;  %v1031_v35 = vunpack.i.l.bf16 %v1030_v26  ;;  %938 = vmatpush3.bf16.msra.mxu1 %v1080_v20  ;;  %v665_v26 = vand.u32 %v1081_v23, %v1164_v41 }
  0xa5   : > { %v1027_v38 = vunpack.i.h.bf16 %v1025_v31  ;;  %v1026_v39 = vunpack.i.l.bf16 %v1025_v31  ;;  %939 = vmatprep.subr.bf16.mxu1 %v1090_v0 }
  0xa6   : > { %v358_v51 = vsel %vm355_vm7, %v353_v43, %v1031_v35  ;;  %v359_v52 = vsel %vm355_vm7, %v354_v44, %v1032_v34 }
  0xa7   : > { %v1040_v45 = vpop.permute.xlu1 %1039  ;;  %v356_v57 = vsel %vm355_vm7, %v351_v46, %v1026_v39  ;;  %v357_v58 = vsel %vm355_vm7, %v352_v47, %v1027_v38 }
  0xa8   : > { %v1042_v48 = vunpack.i.h.bf16 %v1040_v45  ;;  %v1041_v49 = vunpack.i.l.bf16 %v1040_v45  ;;  %v1035_v50 = vpop.permute.xlu0 %1034  ;;  %940 = vmatpush3.bf16.msra.mxu1 %v665_v26 }
  0xa9   : > { %v1037_v53 = vunpack.i.h.bf16 %v1035_v50  ;;  %v1036_v54 = vunpack.i.l.bf16 %v1035_v50 }
  0xaa   : > { %v363_v55 = vsel %vm360_vm8, %v358_v51, %v1041_v49  ;;  %v364_v56 = vsel %vm360_vm8, %v359_v52, %v1042_v48 }
  0xab   : > { %v361_v59 = vsel %vm360_vm8, %v356_v57, %v1036_v54  ;;  %v362_v60 = vsel %vm360_vm8, %v357_v58, %v1037_v53  ;;  %v368_v61 = vsel %vm365_vm9, %v363_v55, 1.0  ;;  %v369_v62 = vsel %vm365_vm9, %v364_v56, 1.0 }
  0xac   : > { %v366_v63 = vsel %vm365_vm9, %v361_v59, 1.0  ;;  %v367_v1 = vsel %vm365_vm9, %v362_v60, 1.0  ;;  %v371_v2 = vpack.c.bf16 %v369_v62, %v368_v61  ;;  %vm772_vm9 = vcmask 1044484  }
  0xad   : > { %v370_v3 = vpack.c.bf16 %v367_v1, %v366_v63 }
  0xaf   : > { %929 = vmatprep.mubr.msk.bf16.mxu0 %vm408_vm10, %v370_v3 }
  0xb0   : > { %930 = vmatmul.mubr.msk.bf16.vlgmr.msra.gmra.mrb[0].mxu0 %vm408_vm10, %v371_v2  ;;  %vm1282_vm10 = vmor %vm415_vm2, %vm772_vm9 }
 0x183   : > { %v931_v4 = vpop.f32.mrb[0].mxu0 }
 0x184   : > { %v455_v5 = vpop.f32.mrb[1].mxu0  ;;  %v476_v9 = vmul.f32 0.2, %v931_v4  ;;  %vm472_vm14 = vcmp.ge.f32.partialorder %v931_v4, 0.0 }
 0x185   : > { %vm470_vm12 = vcmp.ge.f32.partialorder %v455_v5, 0.0  ;;  %v474_v6 = vmul.f32 0.2, %v455_v5  ;;  %v932_v7 = vpop.f32.mrb[2].mxu0 }
 0x186   : > { %v458_v8 = vpop.f32.mrb[3].mxu0  ;;  %v477_v12 = vmul.f32 0.2, %v932_v7  ;;  %vm473_vm15 = vcmp.ge.f32.partialorder %v932_v7, 0.0  ;;  %v480_v14 = vsel %vm472_vm14, %v931_v4, %v476_v9 }
 0x187   : > { %vm471_vm13 = vcmp.ge.f32.partialorder %v458_v8, 0.0  ;;  %v475_v10 = vmul.f32 0.2, %v458_v8  ;;  %v478_v11 = vsel %vm470_vm12, %v455_v5, %v474_v6 }
 0x188   : > { %486 = vrot.lane.b32.xlu0 %v478_v11, %s1099_s9  ;;  %v481_v15 = vsel %vm473_vm15, %v932_v7, %v477_v12 }
 0x189   : > { %v479_v13 = vsel %vm471_vm13, %v458_v8, %v475_v10 }
 0x18a   : > { %488 = vrot.lane.b32.xlu1 %v479_v13, %s1099_s9 }
 0x18c   : > { %490 = vrot.lane.b32.xlu0 %v480_v14, %s1099_s9 }
 0x18e   : > { %492 = vrot.lane.b32.xlu1 %v481_v15, %s1099_s9 }
 0x1fa   : > { %v487_v18 = vpop.permute.xlu0 %486 }
 0x1fb   : > { %v498_v19 = vadd.f32 %v487_v18, %v478_v11 }
 0x1fc   : > { %v489_v21 = vpop.permute.xlu1 %488 }
 0x1fd   : > { %505 = vst.msk [vmem:[#allocation3 + $0x8] sm:$0xff] %vm335_vm3, %v498_v19  ;;  %v499_v22 = vadd.f32 %v489_v21, %v479_v13 }
 0x1fe   : > { %v491_v24 = vpop.permute.xlu0 %490 }
 0x1ff   : > { %506 = vst.msk [vmem:[#allocation3 + $0x10] sm:$0xff] %vm335_vm3, %v499_v22  ;;  %v500_v25 = vadd.f32 %v491_v24, %v480_v14 }
 0x200   : > { %v493_v27 = vpop.permute.xlu1 %492 }
 0x201   : > { %509 = vst.msk [vmem:[#allocation3 + $0x28] sm:$0xff] %vm335_vm3, %v500_v25  ;;  %v501_v28 = vadd.f32 %v493_v27, %v481_v15 }
 0x203   : > { %510 = vst.msk [vmem:[#allocation3 + $0x30] sm:$0xff] %vm335_vm3, %v501_v28 }
 0x204   : > { %v547_v29 = vld [vmem:[#allocation3 + $0x6] sm:$0xff] }
 0x205   : > { %v531_v31 = vld [vmem:[#allocation3 + $0x5] sm:$0xff] }
 0x206   : > { %v548_v30 = vld [vmem:[#allocation3 + $0xe] sm:$0xff]  ;;  %v549_v45 = vld [vmem:[#allocation3 + $0x16] sm:$0x3f]  ;;  %v511_v61 = vld [vmem:[#allocation3 + $0x4] sm:$0xff] }
 0x207   : > { %v532_v32 = vld [vmem:[#allocation3 + $0xd] sm:$0xff]  ;;  %v1048_v33 = vpack.i.bf16 %v548_v30, %v547_v29  ;;  %v533_v46 = vld [vmem:[#allocation3 + $0x15] sm:$0x3f] }
 0x208   : > { %v1043_v34 = vpack.i.bf16 %v532_v32, %v531_v31  ;;  %v550_v35 = vld [vmem:[#allocation3 + $0x26] sm:$0xff]  ;;  %v513_v18 = vld [vmem:[#allocation3 + $0x14] sm:$0x3f] }
 0x209   : > { %v534_v36 = vld [vmem:[#allocation3 + $0x25] sm:$0xff]  ;;  %1049 = vrot.lane.b32.xlu1 %v1048_v33, %s1094_s28  ;;  %v556_v41 = vrot.slane %v550_v35, 2 }
 0x20a   : > { %1044 = vrot.lane.b32.xlu0 %v1043_v34, %s1091_s19  ;;  %v540_v37 = vrot.slane %v534_v36, 2  ;;  %v551_v38 = vld [vmem:[#allocation3 + $0x2e] sm:$0xff]  ;;  %v552_v40 = vld [vmem:[#allocation3 + $0x36] sm:$0x3f]  ;;  %v514_v4 = vld [vmem:[#allocation3 + $0x24] sm:$0xff] }
 0x20b   : > { %v535_v39 = vld [vmem:[#allocation3 + $0x2d] sm:$0xff]  ;;  %v557_v42 = vrot.slane %v551_v38, 2  ;;  %v536_v44 = vld [vmem:[#allocation3 + $0x35] sm:$0x3f]  ;;  %v559_v47 = vrot.slane %v552_v40, 2  ;;  %v562_v50 = vsel %vm520_vm1, %v549_v45, %v556_v41  ;;  %v521_v12 = vrot.slane %v514_v4, 2 }
 0x20c   : > { %v541_v43 = vrot.slane %v535_v39, 2  ;;  %v543_v48 = vrot.slane %v536_v44, 2  ;;  %v546_v52 = vsel %vm520_vm1, %v533_v46, %v540_v37  ;;  %v512_v3 = vld [vmem:[#allocation3 + $0xc] sm:$0xff]  ;;  %v516_v15 = vld [vmem:[#allocation3 + $0x34] sm:$0x3f] }
 0x20d   : > { %v558_v49 = vsel %vm520_vm1, %v556_v41, %v557_v42  ;;  %v560_v55 = vsel %vm520_vm1, %v557_v42, %v559_v47  ;;  %v515_v5 = vld [vmem:[#allocation3 + $0x2c] sm:$0xff]  ;;  %v530_v23 = vsel %vm520_vm1, %v513_v18, %v521_v12  ;;  %v524_v25 = vrot.slane %v516_v15, 2 }
 0x20e   : > { %v542_v51 = vsel %vm520_vm1, %v540_v37, %v541_v43  ;;  %v1058_v53 = vpack.i.bf16 %v558_v49, %v562_v50  ;;  %v544_v56 = vsel %vm520_vm1, %v541_v43, %v543_v48  ;;  %v1068_v57 = vpack.i.bf16 %v559_v47, %v560_v55 }
 0x20f   : > { %v1053_v54 = vpack.i.bf16 %v542_v51, %v546_v52  ;;  %v1063_v58 = vpack.i.bf16 %v543_v48, %v544_v56  ;;  %v522_v13 = vrot.slane %v515_v5, 2 }
 0x210   : > { %1059 = vrot.lane.b32.xlu1 %v1058_v53, %s1094_s28 }
 0x211   : > { %1054 = vrot.lane.b32.xlu0 %v1053_v54, %s1091_s19  ;;  %v523_v24 = vsel %vm520_vm1, %v521_v12, %v522_v13  ;;  %v525_v36 = vsel %vm520_vm1, %v522_v13, %v524_v25 }
 0x214   : > { %1069 = vrot.lane.b32.xlu1 %v1068_v57, %s1094_s28 }
 0x215   : > { %1064 = vrot.lane.b32.xlu0 %v1063_v58, %s1091_s19  ;;  %s953_s19 = smul.u32 12, %s1308_s14 }
 0x217   : > { %s1273_s23 = scalar_lea.vmem %s1304_s3, %s953_s19 }
 0x27b   : > { %v1050_v60 = vpop.permute.xlu1 %1049 }
 0x27c   : > { %v1045_v59 = vpop.permute.xlu0 %1044  ;;  %v1052_v1 = vunpack.i.h.bf16 %v1050_v60  ;;  %v1051_v2 = vunpack.i.l.bf16 %v1050_v60 }
 0x27d   : > { %v1047_v62 = vunpack.i.h.bf16 %v1045_v59  ;;  %v1046_v63 = vunpack.i.l.bf16 %v1045_v59 }
 0x27f   : > { %v605_v6 = vsel %vm335_vm3, %v511_v61, %v1046_v63  ;;  %v606_v7 = vsel %vm335_vm3, %v512_v3, %v1047_v62 }
 0x280   : > { %v612_v8 = vsel %vm345_vm5, %v606_v7, %v1052_v1  ;;  %v611_v9 = vsel %vm345_vm5, %v605_v6, %v1051_v2 }
 0x281   : > { %v618_v10 = vsel %vm355_vm7, %v612_v8, 1.0  ;;  %v617_v11 = vsel %vm355_vm7, %v611_v9, 1.0 }
 0x282   : > { %v623_v14 = vpack.c.bf16 %v618_v10, %v617_v11  ;;  %v1060_v17 = vpop.permute.xlu1 %1059 }
 0x283   : > { %v1055_v16 = vpop.permute.xlu0 %1054  ;;  %v1062_v21 = vunpack.i.h.bf16 %v1060_v17  ;;  %v1061_v22 = vunpack.i.l.bf16 %v1060_v17 }
 0x284   : > { %v1057_v19 = vunpack.i.h.bf16 %v1055_v16  ;;  %v1056_v20 = vunpack.i.l.bf16 %v1055_v16  ;;  %942 = vmatmul.mubr.msk.bf16.vlgmr.msra.gmra.mrb[0].mxu1 %vm654_vm4, %v623_v14 }
 0x285   : > { %945 = vmatprep.mubr.msk.bf16.mxu1 %vm1100_vm0, %v1090_v0 }
 0x286   : > { %v607_v26 = vsel %vm335_vm3, %v530_v23, %v1056_v20  ;;  %v608_v27 = vsel %vm335_vm3, %v523_v24, %v1057_v19  ;;  %v1070_v31 = vpop.permute.xlu1 %1069 }
 0x287   : > { %v614_v28 = vsel %vm345_vm5, %v608_v27, %v1062_v21  ;;  %v613_v29 = vsel %vm345_vm5, %v607_v26, %v1061_v22  ;;  %v1065_v30 = vpop.permute.xlu0 %1064  ;;  %v1072_v41 = vunpack.i.h.bf16 %v1070_v31  ;;  %v1071_v37 = vunpack.i.l.bf16 %v1070_v31 }
 0x288   : > { %v620_v32 = vsel %vm355_vm7, %v614_v28, 1.0  ;;  %v619_v33 = vsel %vm355_vm7, %v613_v29, 1.0  ;;  %v1067_v34 = vunpack.i.h.bf16 %v1065_v30  ;;  %v1066_v35 = vunpack.i.l.bf16 %v1065_v30 }
 0x289   : > { %v624_v38 = vpack.c.bf16 %v620_v32, %v619_v33 }
 0x28a   : > { %v609_v39 = vsel %vm335_vm3, %v525_v36, %v1066_v35  ;;  %v610_v40 = vsel %vm335_vm3, %v524_v25, %v1067_v34 }
 0x28b   : > { %v616_v42 = vsel %vm345_vm5, %v610_v40, %v1072_v41  ;;  %v615_v43 = vsel %vm345_vm5, %v609_v39, %v1071_v37 }
 0x28c   : > { %946 = vmatmul.mubr.msk.bf16.gmra.mrb[4].mxu1 %vm654_vm4, %v624_v38  ;;  %v622_v44 = vsel %vm355_vm7, %v616_v42, 1.0  ;;  %v621_v45 = vsel %vm355_vm7, %v615_v43, 1.0  ;;  %vm757_vm7 = vcmask 124928  }
 0x28d   : > { %949 = vmatprep.mubr.msk.bf16.mxu1 %vm1100_vm0, %v1090_v0  ;;  %v625_v46 = vpack.c.bf16 %v622_v44, %v621_v45 }
 0x294   : > { %950 = vmatmul.mubr.msk.bf16.gmra.mrb[8].mxu1 %vm654_vm4, %v625_v46 }
 0x357   : > { %v701_v47 = vpop.f32.mrb[0].mxu1 }
 0x358   : > { %vm724_vm6 = vcmp.ge.f32.partialorder %v701_v47, 0.0  ;;  %v730_v48 = vmul.f32 0.2, %v701_v47  ;;  %v943_v49 = vpop.f32.mrb[1].mxu1 }
 0x359   : > { %v704_v50 = vpop.f32.mrb[2].mxu1 }
 0x35a   : > { %v736_v0 = vsel %vm724_vm6, %v701_v47, %v730_v48  ;;  %vm725_vm3 = vcmp.ge.f32.partialorder %v704_v50, 0.0  ;;  %v731_v51 = vmul.f32 0.2, %v704_v50  ;;  %v944_v52 = vpop.f32.mrb[3].mxu1 }
 0x35b   : > { %v889_v53 = vpack.c.bf16 %v736_v0, %v736_v0 }
 0x35c   : > { %v737_v54 = vsel %vm725_vm3, %v704_v50, %v731_v51 }
 0x35d   : > { %755 = vst.msk [vmem:[%s1273_s23] sm:$0xf] %vm502_vm11, %v889_v53  ;;  %v890_v55 = vpack.c.bf16 %v737_v54, %v737_v54 }
 0x35f   : > { %756 = vst.msk [vmem:[%s1273_s23 + $0x4] sm:$0xf] %vm502_vm11, %v890_v55  ;;  %v709_v56 = vpop.f32.mrb[4].mxu1 }
 0x360   : > { %vm726_vm5 = vcmp.ge.f32.partialorder %v709_v56, 0.0  ;;  %v732_v57 = vmul.f32 0.2, %v709_v56  ;;  %v947_v58 = vpop.f32.mrb[5].mxu1 }
 0x361   : > { %v712_v59 = vpop.f32.mrb[6].mxu1 }
 0x362   : > { %v738_v60 = vsel %vm726_vm5, %v709_v56, %v732_v57  ;;  %vm727_vm8 = vcmp.ge.f32.partialorder %v712_v59, 0.0  ;;  %v733_v61 = vmul.f32 0.2, %v712_v59  ;;  %v948_v62 = vpop.f32.mrb[7].mxu1 }
 0x363   : > { %v891_v63 = vpack.c.bf16 %v738_v60, %v738_v60 }
 0x364   : > { %v739_v1 = vsel %vm727_vm8, %v712_v59, %v733_v61 }
 0x365   : > { %758 = vst.msk [vmem:[%s1273_s23 + $0x8] sm:$0x7] %vm757_vm7, %v891_v63  ;;  %v893_v2 = vpack.c.bf16 %v739_v1, %v739_v1  ;;  %v882_v4 = vrot.slane %v891_v63, 11 }
 0x367   : > { %v776_v5 = vrot.slane %v893_v2, 7  ;;  %v717_v6 = vpop.f32.mrb[8].mxu1 }
 0x368   : > { %vm728_vm12 = vcmp.ge.f32.partialorder %v717_v6, 0.0  ;;  %v734_v7 = vmul.f32 0.2, %v717_v6  ;;  %v951_v8 = vpop.f32.mrb[9].mxu1 }
 0x369   : > { %v777_v9 = vsel %vm1282_vm10, %v882_v4, %v776_v5  ;;  %v720_v10 = vpop.f32.mrb[10].mxu1  ;;  %v778_v16 = vrot.slane %v776_v5, 4 }
 0x36a   : > { %883 = vst.msk [vmem:[%s1273_s23 + $0xc] sm:$0xf] %vm502_vm11, %v777_v9  ;;  %v740_v11 = vsel %vm728_vm12, %v717_v6, %v734_v7  ;;  %vm729_vm13 = vcmp.ge.f32.partialorder %v720_v10, 0.0  ;;  %v735_v12 = vmul.f32 0.2, %v720_v10  ;;  %v952_v13 = vpop.f32.mrb[11].mxu1 }
 0x36b   : > { %v894_v14 = vpack.c.bf16 %v740_v11, %v740_v11 }
 0x36c   : > { %v741_v15 = vsel %vm729_vm13, %v720_v10, %v735_v12 }
 0x36d   : > { %v779_v17 = vrot.slane %v894_v14, 7  ;;  %v895_v18 = vpack.c.bf16 %v741_v15, %v741_v15 }
 0x36f   : > { %v780_v19 = vsel %vm1282_vm10, %v778_v16, %v779_v17  ;;  %v781_v20 = vrot.slane %v779_v17, 4  ;;  %v782_v21 = vrot.slane %v895_v18, 7 }
 0x370   : > { %884 = vst.msk [vmem:[%s1273_s23 + $0x10] sm:$0xf] %vm502_vm11, %v780_v19 }
 0x371   : > { %v783_v22 = vsel %vm1282_vm10, %v781_v20, %v782_v21 }
 0x372   : > { %885 = vst.msk [vmem:[%s1273_s23 + $0x14] sm:$0x7] %vm757_vm7, %v783_v22 }
 0x373 PF: > { %s13_s12 = sadd.s32 1, %s1088_s12  }
 0x374   : > { %p10_p4 = scmp.ge.s32.totalorder %s13_s12, 4  }
 0x376   :  { %12 = sbr.rel (!%p10_p4) target bundleno = 1 (0x1), region = 64 }

</bundles_post_ra>
